<compile_context>
chip_gen: v6e
topology: v6e:2x2x1
jax: 0.10.0
libtpu: 0.0.40
codegen_flags: <defaults>
</compile_context>

<pallas_src>
import functools

import jax
import jax.numpy as jnp
from jax.experimental import pallas as pl
from jax.experimental.pallas import tpu as pltpu

# Non-center 3x3 taps, in the order shared by the kernel and the host-side masks.
_TAPS = tuple((ky, kx) for ky in range(3) for kx in range(3) if (ky, kx) != (1, 1))


def _bottleneck_kernel(x_ref, vec_ref, w1t_ref, w2_ref, w3t_ref, mask_ref, out_ref,
                       *, Cin, PP, planes, Cout, CPAD, W, HW_blk):
    """One batch-block per grid step; all tensors are (channels, lanes) lane-dense."""
    # Packed per-channel vectors (sublane-stacked, tile-aligned offsets).
    s1 = vec_ref[0:Cin, :]
    b1 = vec_ref[CPAD:CPAD + Cin, :]
    b2 = vec_ref[2 * CPAD:2 * CPAD + PP, :]          # bn2 shift + s2*conv1_bias (pad rows = 0)
    b3 = vec_ref[3 * CPAD:3 * CPAD + planes, :]      # bn3 shift + s3*conv2_bias
    cb3 = vec_ref[4 * CPAD:4 * CPAD + Cout, :]       # conv3 bias

    # ---- bn1 (folded) + relu
    t = jnp.maximum(x_ref[...] * s1 + b1, 0.0)                            # (Cin, HW_blk)

    # ---- conv1 (1x1): bn2 scale folded into w1t rows; conv1 bias folded into b2.
    t2 = jnp.maximum(
        jnp.dot(w1t_ref[...], t, preferred_element_type=jnp.float32) + b2, 0.0)   # (PP, HW_blk)

    # ---- conv2 (3x3, stride=1, SAME): 9 accumulated matmuls.  Non-center taps are
    #      XLU lane-rolls of t2 times precomputed border masks (which zero every
    #      lane the circular roll wraps or that crosses a row / image boundary).
    #      bn3 scale folded into w2 rows.
    acc = jnp.dot(w2_ref[4], t2, preferred_element_type=jnp.float32)      # center tap
    for mi, (ky, kx) in enumerate(_TAPS):
        off = (ky - 1) * W + (kx - 1)
        shifted = pltpu.roll(t2, shift=(-off) % HW_blk, axis=1)
        shifted = shifted * mask_ref[mi:mi + 1, :]
        acc = acc + jnp.dot(w2_ref[ky * 3 + kx], shifted,
                            preferred_element_type=jnp.float32)           # (planes, HW_blk)

    # ---- bn3 (folded) + relu
    t4 = jnp.maximum(acc + b3, 0.0)

    # ---- conv3 (1x1) + bias + identity residual (re-read x_ref late: low vreg pressure)
    t5 = jnp.dot(w3t_ref[...], t4, preferred_element_type=jnp.float32) + cb3
    out_ref[...] = (t5 + x_ref[...]).astype(out_ref.dtype)


def _border_masks(H, W, imgs):
    """(8, imgs*H*W) f32 masks, one row per non-center tap, 1.0 where the shifted
    source pixel is inside the same image, 0.0 otherwise."""
    pos = jnp.arange(H * W)
    hh = pos // W
    ww = pos % W
    rows = []
    for ky, kx in _TAPS:
        dy, dx = ky - 1, kx - 1
        m = jnp.ones((H * W,), jnp.bool_)
        if dy == -1:
            m = m & (hh >= 1)
        if dy == 1:
            m = m & (hh <= H - 2)
        if dx == -1:
            m = m & (ww >= 1)
        if dx == 1:
            m = m & (ww <= W - 2)
        rows.append(m)
    masks = jnp.stack(rows).astype(jnp.float32)        # (8, HW)
    return jnp.tile(masks, (1, imgs))                  # (8, imgs*HW)


def _prep_kernel_params(p, inplanes, planes, cout):
    """Math-layout params -> kernel layout; fold bn2/bn3 scales into the weights and
    conv1/conv2 biases into the following shifts; pad `planes` to a sublane tile."""
    f32 = jnp.float32
    pp = ((planes + 7) // 8) * 8
    s2 = p["s2"].astype(f32)
    s3 = p["s3"].astype(f32)

    # conv1^T with bn2 scale folded into its output rows; padded rows are zero.
    w1t = jnp.zeros((pp, inplanes), f32).at[:planes, :].set(
        (s2[:, None] * p["w1"].T).astype(f32))
    b2 = jnp.zeros((pp,), f32).at[:planes].set(p["b2"] + s2 * p["cb1"])   # pad rows stay 0

    # conv2 HWIO (3,3,ci,co) -> per-tap (co, ci), bn3 scale folded into co rows,
    # ci padded to pp (matches the exactly-zero padded rows of t2).
    w2_k = p["w2"].reshape(9, planes, planes)                             # (tap, ci, co)
    w2 = jnp.zeros((9, planes, pp), f32).at[:, :, :planes].set(
        (jnp.transpose(w2_k, (0, 2, 1)) * s3[None, :, None]).astype(f32))
    b3 = (p["b3"] + s3 * p["cb2"]).astype(f32)

    w3t = p["w3"].T.astype(f32)                                           # (cout, planes)

    # Pack remaining per-channel vectors into one sublane-stacked column (one DMA).
    cpad = ((max(inplanes, pp, planes, cout) + 7) // 8) * 8
    vecs = jnp.zeros((5 * cpad, 1), f32)
    vecs = vecs.at[0:inplanes, 0].set(p["s1"].astype(f32))
    vecs = vecs.at[cpad:cpad + inplanes, 0].set(p["b1"].astype(f32))
    vecs = vecs.at[2 * cpad:2 * cpad + pp, 0].set(b2)
    vecs = vecs.at[3 * cpad:3 * cpad + planes, 0].set(b3)
    vecs = vecs.at[4 * cpad:4 * cpad + cout, 0].set(p["cb3"].astype(f32))
    return vecs, w1t, w2, w3t, pp, cpad


def bottleneck_pallas(x_nchw, params):
    """x_nchw: (N, Cin, H, W) float32.  Returns (N, Cin, H, W) float32."""
    N, Cin, H, W = x_nchw.shape
    planes = params["w1"].shape[1]
    Cout = params["w3"].shape[1]
    assert Cout == Cin, "identity residual requires inplanes == planes * expansion"
    HW = H * W

    vecs, w1t, w2, w3t, PP, CPAD = _prep_kernel_params(params, Cin, planes, Cout)

    # Batch fusion: all images of a block live on the lane axis.  Small batches run
    # as a single grid step (per-step overhead dominates there); batches >= 4 split
    # into two parallel halves so v7x's two TensorCores both get work.
    nblk = 2 if (N >= 4 and N % 2 == 0) else 1
    imgs = N // nblk
    HWB = imgs * HW

    # channels-on-sublane, (batch*spatial) lane-dense (wrapper-side layout plumbing).
    x_cs = jnp.transpose(x_nchw.reshape(N, Cin, HW), (1, 0, 2)).reshape(Cin, N * HW)
    masks = _border_masks(H, W, imgs)                                    # (8, HWB)

    const2 = lambda shape: pl.BlockSpec(shape, lambda g: (0, 0))
    kernel = functools.partial(_bottleneck_kernel, Cin=Cin, PP=PP, planes=planes,
                               Cout=Cout, CPAD=CPAD, W=W, HW_blk=HWB)

    out = pl.pallas_call(
        kernel,
        out_shape=jax.ShapeDtypeStruct((Cout, N * HW), jnp.float32),
        grid_spec=pltpu.PrefetchScalarGridSpec(
            num_scalar_prefetch=0,
            grid=(nblk,),
            in_specs=[
                pl.BlockSpec((Cin, HWB), lambda g: (0, g)),              # x (fused batch block)
                const2((5 * CPAD, 1)),                                   # packed per-channel vecs
                const2((PP, Cin)),                                       # conv1^T * s2
                pl.BlockSpec((9, planes, PP), lambda g: (0, 0, 0)),      # conv2 taps * s3
                const2((Cout, planes)),                                  # conv3^T
                const2((8, HWB)),                                        # border masks
            ],
            out_specs=pl.BlockSpec((Cout, HWB), lambda g: (0, g)),
        ),
        compiler_params=pltpu.CompilerParams(
            dimension_semantics=("parallel",),
            vmem_limit_bytes=32 * 1024 * 1024),
    )(x_cs, vecs, w1t, w2, w3t, masks)

    return jnp.transpose(out.reshape(Cout, N, HW), (1, 0, 2)).reshape(N, Cout, H, W)


def _fold_bn(gamma, beta, mean, var, eps=1e-5):
    scale = gamma / jnp.sqrt(var + eps)
    shift = beta - mean * scale
    return scale, shift


def make_params(key, inplanes, planes):
    """Deterministic synthetic parameters matching Bottleneck.__init__ shapes."""
    ks = jax.random.split(key, 9)
    expansion = 2

    def bn_params(k, c):
        k0, k1, k2, k3 = jax.random.split(k, 4)
        gamma = 0.5 + jax.random.uniform(k0, (c,), jnp.float32)
        beta = 0.1 * jax.random.normal(k1, (c,), jnp.float32)
        mean = 0.1 * jax.random.normal(k2, (c,), jnp.float32)
        var = 0.5 + jax.random.uniform(k3, (c,), jnp.float32)
        return _fold_bn(gamma, beta, mean, var)

    s1, b1 = bn_params(ks[0], inplanes)
    s2, b2 = bn_params(ks[1], planes)
    s3, b3 = bn_params(ks[2], planes)

    # conv1: 1x1, inplanes -> planes   (stored as (Cin, Cout))
    w1 = 0.2 * jax.random.normal(ks[3], (inplanes, planes), jnp.float32)
    cb1 = 0.05 * jax.random.normal(ks[4], (planes,), jnp.float32)
    # conv2: 3x3, planes -> planes     (stored HWIO: (3, 3, Cin, Cout))
    w2 = 0.2 * jax.random.normal(ks[5], (3, 3, planes, planes), jnp.float32)
    cb2 = 0.05 * jax.random.normal(ks[6], (planes,), jnp.float32)
    # conv3: 1x1, planes -> planes*expansion
    w3 = 0.2 * jax.random.normal(ks[7], (planes, planes * expansion), jnp.float32)
    cb3 = 0.05 * jax.random.normal(ks[8], (planes * expansion,), jnp.float32)

    return dict(s1=s1, b1=b1, w1=w1, cb1=cb1,
                s2=s2, b2=b2, w2=w2, cb2=cb2,
                s3=s3, b3=b3, w3=w3, cb3=cb3)


def bottleneck_reference(x, p):
    """Pure-JAX reference mirroring the PyTorch forward (NCHW, f32 precision)."""
    hi = jax.lax.Precision.HIGHEST
    relu = lambda v: jnp.maximum(v, 0.0)
    bc = lambda v: v[None, :, None, None]
    t = relu(x * bc(p["s1"]) + bc(p["b1"]))
    t1 = jnp.einsum("nchw,cd->ndhw", t, p["w1"], precision=hi) + bc(p["cb1"])
    t2 = relu(t1 * bc(p["s2"]) + bc(p["b2"]))
    t3 = jax.lax.conv_general_dilated(
        t2, p["w2"], window_strides=(1, 1), padding="SAME",
        dimension_numbers=("NCHW", "HWIO", "NCHW"), precision=hi) + bc(p["cb2"])
    t4 = relu(t3 * bc(p["s3"]) + bc(p["b3"]))
    t5 = jnp.einsum("nchw,cd->ndhw", t4, p["w3"], precision=hi) + bc(p["cb3"])
    return t5 + x


if __name__ == "__main__":
    key = jax.random.PRNGKey(0)
    k_x, k_p = jax.random.split(key)

    # Bottleneck(inplanes=8, planes=4, BN=True, stride=1, downsample=None)
    N, inplanes, planes, Hs, Ws = 2, 8, 4, 16, 16
    x_nchw = jax.random.normal(k_x, (N, inplanes, Hs, Ws), jnp.float32)
    params = make_params(k_p, inplanes, planes)

    out = bottleneck_pallas(x_nchw, params)
    out = jax.block_until_ready(out)

    ref = bottleneck_reference(x_nchw, params)
    assert out.shape == (N, inplanes, Hs, Ws)
    max_err = float(jnp.max(jnp.abs(out - ref)))
    assert jnp.allclose(out, ref, atol=1e-4, rtol=1e-4), max_err

    print("KERNEL_OK")
</pallas_src>

<mosaic_0001>
module attributes {stable_mosaic.version = 11 : i64} {
  func.func @_bottleneck_kernel(%arg0: i32, %arg1: memref<8x512xf32, #tpu.memory_space<vmem>>, %arg2: memref<40x1xf32, #tpu.memory_space<vmem>>, %arg3: memref<8x8xf32, #tpu.memory_space<vmem>>, %arg4: memref<9x4x8xf32, #tpu.memory_space<vmem>>, %arg5: memref<8x4xf32, #tpu.memory_space<vmem>>, %arg6: memref<8x512xf32, #tpu.memory_space<vmem>>, %arg7: memref<8x512xf32, #tpu.memory_space<vmem>>) attributes {dimension_semantics = [#tpu.dimension_semantics<parallel>], iteration_bounds = array<i64: 1>, scalar_prefetch = 0 : i64, scratch_operands = 0 : i64, tpu.core_type = #tpu.core_type<tc>, window_params = [{transform_indices = @transform_0, window_bounds = array<i64: 8, 512>}, {pipeline_mode = #tpu.pipeline_mode<synchronous>, transform_indices = @transform_1, window_bounds = array<i64: 40, 1>}, {pipeline_mode = #tpu.pipeline_mode<synchronous>, transform_indices = @transform_2, window_bounds = array<i64: 8, 8>}, {pipeline_mode = #tpu.pipeline_mode<synchronous>, transform_indices = @transform_3, window_bounds = array<i64: 9, 4, 8>}, {pipeline_mode = #tpu.pipeline_mode<synchronous>, transform_indices = @transform_4, window_bounds = array<i64: 8, 4>}, {pipeline_mode = #tpu.pipeline_mode<synchronous>, transform_indices = @transform_5, window_bounds = array<i64: 8, 512>}, {transform_indices = @transform_6, window_bounds = array<i64: 8, 512>}]} {
    %c0 = arith.constant 0 : index
    %c0_0 = arith.constant 0 : index
    %0 = vector.load %arg2[%c0, %c0_0] : memref<40x1xf32, #tpu.memory_space<vmem>>, vector<8x1xf32>
    %c8 = arith.constant 8 : index
    %c0_1 = arith.constant 0 : index
    %1 = vector.load %arg2[%c8, %c0_1] : memref<40x1xf32, #tpu.memory_space<vmem>>, vector<8x1xf32>
    %c16 = arith.constant 16 : index
    %c0_2 = arith.constant 0 : index
    %2 = vector.load %arg2[%c16, %c0_2] : memref<40x1xf32, #tpu.memory_space<vmem>>, vector<8x1xf32>
    %c24 = arith.constant 24 : index
    %c0_3 = arith.constant 0 : index
    %3 = vector.load %arg2[%c24, %c0_3] : memref<40x1xf32, #tpu.memory_space<vmem>>, vector<4x1xf32>
    %c32 = arith.constant 32 : index
    %c0_4 = arith.constant 0 : index
    %4 = vector.load %arg2[%c32, %c0_4] : memref<40x1xf32, #tpu.memory_space<vmem>>, vector<8x1xf32>
    %c0_5 = arith.constant 0 : index
    %c0_6 = arith.constant 0 : index
    %5 = vector.load %arg1[%c0_5, %c0_6] : memref<8x512xf32, #tpu.memory_space<vmem>>, vector<8x512xf32>
    %6 = vector.broadcast %0 : vector<8x1xf32> to vector<8x512xf32>
    %7 = arith.mulf %5, %6 : vector<8x512xf32>
    %8 = vector.broadcast %1 : vector<8x1xf32> to vector<8x512xf32>
    %9 = arith.addf %7, %8 : vector<8x512xf32>
    %cst = arith.constant 0.000000e+00 : f32
    %10 = vector.broadcast %cst : f32 to vector<8x512xf32>
    %11 = arith.maximumf %9, %10 : vector<8x512xf32>
    %c0_7 = arith.constant 0 : index
    %c0_8 = arith.constant 0 : index
    %12 = vector.load %arg3[%c0_7, %c0_8] : memref<8x8xf32, #tpu.memory_space<vmem>>, vector<8x8xf32>
    %cst_9 = arith.constant dense<0.000000e+00> : vector<8x512xf32>
    %13 = tpu.matmul %12, %11, %cst_9 {dimension_numbers = #tpu.dot_dimension_numbers<[1], [0], [0], [1], [0, 0, 1, 1], [], []>} : vector<8x8xf32>, vector<8x512xf32>, vector<8x512xf32> -> vector<8x512xf32>
    %14 = vector.broadcast %2 : vector<8x1xf32> to vector<8x512xf32>
    %15 = arith.addf %13, %14 : vector<8x512xf32>
    %cst_10 = arith.constant 0.000000e+00 : f32
    %16 = vector.broadcast %cst_10 : f32 to vector<8x512xf32>
    %17 = arith.maximumf %15, %16 : vector<8x512xf32>
    %c4 = arith.constant 4 : index
    %c0_11 = arith.constant 0 : index
    %c0_12 = arith.constant 0 : index
    %18 = vector.load %arg4[%c4, %c0_11, %c0_12] : memref<9x4x8xf32, #tpu.memory_space<vmem>>, vector<1x4x8xf32>
    %19 = vector.shape_cast %18 : vector<1x4x8xf32> to vector<4x8xf32>
    %cst_13 = arith.constant dense<0.000000e+00> : vector<4x512xf32>
    %20 = tpu.matmul %19, %17, %cst_13 {dimension_numbers = #tpu.dot_dimension_numbers<[1], [0], [0], [1], [0, 0, 1, 1], [], []>} : vector<4x8xf32>, vector<8x512xf32>, vector<4x512xf32> -> vector<4x512xf32>
    %c17_i32 = arith.constant 17 : i32
    %21 = tpu.dynamic_rotate %17 by %c17_i32 dim 1 : vector<8x512xf32>, i32 -> vector<8x512xf32>
    %c0_14 = arith.constant 0 : index
    %c0_15 = arith.constant 0 : index
    %22 = vector.load %arg6[%c0_14, %c0_15] : memref<8x512xf32, #tpu.memory_space<vmem>>, vector<1x512xf32>
    %23 = vector.broadcast %22 : vector<1x512xf32> to vector<8x512xf32>
    %24 = arith.mulf %21, %23 : vector<8x512xf32>
    %c0_16 = arith.constant 0 : index
    %c0_17 = arith.constant 0 : index
    %c0_18 = arith.constant 0 : index
    %25 = vector.load %arg4[%c0_16, %c0_17, %c0_18] : memref<9x4x8xf32, #tpu.memory_space<vmem>>, vector<1x4x8xf32>
    %26 = vector.shape_cast %25 : vector<1x4x8xf32> to vector<4x8xf32>
    %cst_19 = arith.constant dense<0.000000e+00> : vector<4x512xf32>
    %27 = tpu.matmul %26, %24, %cst_19 {dimension_numbers = #tpu.dot_dimension_numbers<[1], [0], [0], [1], [0, 0, 1, 1], [], []>} : vector<4x8xf32>, vector<8x512xf32>, vector<4x512xf32> -> vector<4x512xf32>
    %28 = arith.addf %20, %27 : vector<4x512xf32>
    %c16_i32 = arith.constant 16 : i32
    %29 = tpu.dynamic_rotate %17 by %c16_i32 dim 1 : vector<8x512xf32>, i32 -> vector<8x512xf32>
    %c1 = arith.constant 1 : index
    %c0_20 = arith.constant 0 : index
    %30 = vector.load %arg6[%c1, %c0_20] : memref<8x512xf32, #tpu.memory_space<vmem>>, vector<1x512xf32>
    %31 = vector.broadcast %30 : vector<1x512xf32> to vector<8x512xf32>
    %32 = arith.mulf %29, %31 : vector<8x512xf32>
    %c1_21 = arith.constant 1 : index
    %c0_22 = arith.constant 0 : index
    %c0_23 = arith.constant 0 : index
    %33 = vector.load %arg4[%c1_21, %c0_22, %c0_23] : memref<9x4x8xf32, #tpu.memory_space<vmem>>, vector<1x4x8xf32>
    %34 = vector.shape_cast %33 : vector<1x4x8xf32> to vector<4x8xf32>
    %cst_24 = arith.constant dense<0.000000e+00> : vector<4x512xf32>
    %35 = tpu.matmul %34, %32, %cst_24 {dimension_numbers = #tpu.dot_dimension_numbers<[1], [0], [0], [1], [0, 0, 1, 1], [], []>} : vector<4x8xf32>, vector<8x512xf32>, vector<4x512xf32> -> vector<4x512xf32>
    %36 = arith.addf %28, %35 : vector<4x512xf32>
    %c15_i32 = arith.constant 15 : i32
    %37 = tpu.dynamic_rotate %17 by %c15_i32 dim 1 : vector<8x512xf32>, i32 -> vector<8x512xf32>
    %c2 = arith.constant 2 : index
    %c0_25 = arith.constant 0 : index
    %38 = vector.load %arg6[%c2, %c0_25] : memref<8x512xf32, #tpu.memory_space<vmem>>, vector<1x512xf32>
    %39 = vector.broadcast %38 : vector<1x512xf32> to vector<8x512xf32>
    %40 = arith.mulf %37, %39 : vector<8x512xf32>
    %c2_26 = arith.constant 2 : index
    %c0_27 = arith.constant 0 : index
    %c0_28 = arith.constant 0 : index
    %41 = vector.load %arg4[%c2_26, %c0_27, %c0_28] : memref<9x4x8xf32, #tpu.memory_space<vmem>>, vector<1x4x8xf32>
    %42 = vector.shape_cast %41 : vector<1x4x8xf32> to vector<4x8xf32>
    %cst_29 = arith.constant dense<0.000000e+00> : vector<4x512xf32>
    %43 = tpu.matmul %42, %40, %cst_29 {dimension_numbers = #tpu.dot_dimension_numbers<[1], [0], [0], [1], [0, 0, 1, 1], [], []>} : vector<4x8xf32>, vector<8x512xf32>, vector<4x512xf32> -> vector<4x512xf32>
    %44 = arith.addf %36, %43 : vector<4x512xf32>
    %c1_i32 = arith.constant 1 : i32
    %45 = tpu.dynamic_rotate %17 by %c1_i32 dim 1 : vector<8x512xf32>, i32 -> vector<8x512xf32>
    %c3 = arith.constant 3 : index
    %c0_30 = arith.constant 0 : index
    %46 = vector.load %arg6[%c3, %c0_30] : memref<8x512xf32, #tpu.memory_space<vmem>>, vector<1x512xf32>
    %47 = vector.broadcast %46 : vector<1x512xf32> to vector<8x512xf32>
    %48 = arith.mulf %45, %47 : vector<8x512xf32>
    %c3_31 = arith.constant 3 : index
    %c0_32 = arith.constant 0 : index
    %c0_33 = arith.constant 0 : index
    %49 = vector.load %arg4[%c3_31, %c0_32, %c0_33] : memref<9x4x8xf32, #tpu.memory_space<vmem>>, vector<1x4x8xf32>
    %50 = vector.shape_cast %49 : vector<1x4x8xf32> to vector<4x8xf32>
    %cst_34 = arith.constant dense<0.000000e+00> : vector<4x512xf32>
    %51 = tpu.matmul %50, %48, %cst_34 {dimension_numbers = #tpu.dot_dimension_numbers<[1], [0], [0], [1], [0, 0, 1, 1], [], []>} : vector<4x8xf32>, vector<8x512xf32>, vector<4x512xf32> -> vector<4x512xf32>
    %52 = arith.addf %44, %51 : vector<4x512xf32>
    %c511_i32 = arith.constant 511 : i32
    %53 = tpu.dynamic_rotate %17 by %c511_i32 dim 1 : vector<8x512xf32>, i32 -> vector<8x512xf32>
    %c4_35 = arith.constant 4 : index
    %c0_36 = arith.constant 0 : index
    %54 = vector.load %arg6[%c4_35, %c0_36] : memref<8x512xf32, #tpu.memory_space<vmem>>, vector<1x512xf32>
    %55 = vector.broadcast %54 : vector<1x512xf32> to vector<8x512xf32>
    %56 = arith.mulf %53, %55 : vector<8x512xf32>
    %c5 = arith.constant 5 : index
    %c0_37 = arith.constant 0 : index
    %c0_38 = arith.constant 0 : index
    %57 = vector.load %arg4[%c5, %c0_37, %c0_38] : memref<9x4x8xf32, #tpu.memory_space<vmem>>, vector<1x4x8xf32>
    %58 = vector.shape_cast %57 : vector<1x4x8xf32> to vector<4x8xf32>
    %cst_39 = arith.constant dense<0.000000e+00> : vector<4x512xf32>
    %59 = tpu.matmul %58, %56, %cst_39 {dimension_numbers = #tpu.dot_dimension_numbers<[1], [0], [0], [1], [0, 0, 1, 1], [], []>} : vector<4x8xf32>, vector<8x512xf32>, vector<4x512xf32> -> vector<4x512xf32>
    %60 = arith.addf %52, %59 : vector<4x512xf32>
    %c497_i32 = arith.constant 497 : i32
    %61 = tpu.dynamic_rotate %17 by %c497_i32 dim 1 : vector<8x512xf32>, i32 -> vector<8x512xf32>
    %c5_40 = arith.constant 5 : index
    %c0_41 = arith.constant 0 : index
    %62 = vector.load %arg6[%c5_40, %c0_41] : memref<8x512xf32, #tpu.memory_space<vmem>>, vector<1x512xf32>
    %63 = vector.broadcast %62 : vector<1x512xf32> to vector<8x512xf32>
    %64 = arith.mulf %61, %63 : vector<8x512xf32>
    %c6 = arith.constant 6 : index
    %c0_42 = arith.constant 0 : index
    %c0_43 = arith.constant 0 : index
    %65 = vector.load %arg4[%c6, %c0_42, %c0_43] : memref<9x4x8xf32, #tpu.memory_space<vmem>>, vector<1x4x8xf32>
    %66 = vector.shape_cast %65 : vector<1x4x8xf32> to vector<4x8xf32>
    %cst_44 = arith.constant dense<0.000000e+00> : vector<4x512xf32>
    %67 = tpu.matmul %66, %64, %cst_44 {dimension_numbers = #tpu.dot_dimension_numbers<[1], [0], [0], [1], [0, 0, 1, 1], [], []>} : vector<4x8xf32>, vector<8x512xf32>, vector<4x512xf32> -> vector<4x512xf32>
    %68 = arith.addf %60, %67 : vector<4x512xf32>
    %c496_i32 = arith.constant 496 : i32
    %69 = tpu.dynamic_rotate %17 by %c496_i32 dim 1 : vector<8x512xf32>, i32 -> vector<8x512xf32>
    %c6_45 = arith.constant 6 : index
    %c0_46 = arith.constant 0 : index
    %70 = vector.load %arg6[%c6_45, %c0_46] : memref<8x512xf32, #tpu.memory_space<vmem>>, vector<1x512xf32>
    %71 = vector.broadcast %70 : vector<1x512xf32> to vector<8x512xf32>
    %72 = arith.mulf %69, %71 : vector<8x512xf32>
    %c7 = arith.constant 7 : index
    %c0_47 = arith.constant 0 : index
    %c0_48 = arith.constant 0 : index
    %73 = vector.load %arg4[%c7, %c0_47, %c0_48] : memref<9x4x8xf32, #tpu.memory_space<vmem>>, vector<1x4x8xf32>
    %74 = vector.shape_cast %73 : vector<1x4x8xf32> to vector<4x8xf32>
    %cst_49 = arith.constant dense<0.000000e+00> : vector<4x512xf32>
    %75 = tpu.matmul %74, %72, %cst_49 {dimension_numbers = #tpu.dot_dimension_numbers<[1], [0], [0], [1], [0, 0, 1, 1], [], []>} : vector<4x8xf32>, vector<8x512xf32>, vector<4x512xf32> -> vector<4x512xf32>
    %76 = arith.addf %68, %75 : vector<4x512xf32>
    %c495_i32 = arith.constant 495 : i32
    %77 = tpu.dynamic_rotate %17 by %c495_i32 dim 1 : vector<8x512xf32>, i32 -> vector<8x512xf32>
    %c7_50 = arith.constant 7 : index
    %c0_51 = arith.constant 0 : index
    %78 = vector.load %arg6[%c7_50, %c0_51] : memref<8x512xf32, #tpu.memory_space<vmem>>, vector<1x512xf32>
    %79 = vector.broadcast %78 : vector<1x512xf32> to vector<8x512xf32>
    %80 = arith.mulf %77, %79 : vector<8x512xf32>
    %c8_52 = arith.constant 8 : index
    %c0_53 = arith.constant 0 : index
    %c0_54 = arith.constant 0 : index
    %81 = vector.load %arg4[%c8_52, %c0_53, %c0_54] : memref<9x4x8xf32, #tpu.memory_space<vmem>>, vector<1x4x8xf32>
    %82 = vector.shape_cast %81 : vector<1x4x8xf32> to vector<4x8xf32>
    %cst_55 = arith.constant dense<0.000000e+00> : vector<4x512xf32>
    %83 = tpu.matmul %82, %80, %cst_55 {dimension_numbers = #tpu.dot_dimension_numbers<[1], [0], [0], [1], [0, 0, 1, 1], [], []>} : vector<4x8xf32>, vector<8x512xf32>, vector<4x512xf32> -> vector<4x512xf32>
    %84 = arith.addf %76, %83 : vector<4x512xf32>
    %85 = vector.broadcast %3 : vector<4x1xf32> to vector<4x512xf32>
    %86 = arith.addf %84, %85 : vector<4x512xf32>
    %cst_56 = arith.constant 0.000000e+00 : f32
    %87 = vector.broadcast %cst_56 : f32 to vector<4x512xf32>
    %88 = arith.maximumf %86, %87 : vector<4x512xf32>
    %c0_57 = arith.constant 0 : index
    %c0_58 = arith.constant 0 : index
    %89 = vector.load %arg5[%c0_57, %c0_58] : memref<8x4xf32, #tpu.memory_space<vmem>>, vector<8x4xf32>
    %cst_59 = arith.constant dense<0.000000e+00> : vector<8x512xf32>
    %90 = tpu.matmul %89, %88, %cst_59 {dimension_numbers = #tpu.dot_dimension_numbers<[1], [0], [0], [1], [0, 0, 1, 1], [], []>} : vector<8x4xf32>, vector<4x512xf32>, vector<8x512xf32> -> vector<8x512xf32>
    %91 = vector.broadcast %4 : vector<8x1xf32> to vector<8x512xf32>
    %92 = arith.addf %90, %91 : vector<8x512xf32>
    %c0_60 = arith.constant 0 : index
    %c0_61 = arith.constant 0 : index
    %93 = vector.load %arg1[%c0_60, %c0_61] : memref<8x512xf32, #tpu.memory_space<vmem>>, vector<8x512xf32>
    %94 = arith.addf %92, %93 : vector<8x512xf32>
    %c0_62 = arith.constant 0 : index
    %c0_63 = arith.constant 0 : index
    %95 = vector.load %arg7[%c0_62, %c0_63] : memref<8x512xf32, #tpu.memory_space<vmem>>, vector<8x512xf32>
    tpu.vector_store %arg7[%c0_62, %c0_63], %94 {strides = array<i32>} : memref<8x512xf32, #tpu.memory_space<vmem>>, vector<8x512xf32>,
    return
  }
  func.func @transform_0(%arg0: i32) -> (i32, i32) {
    %c0_i32 = arith.constant 0 : i32
    %c0_i32_0 = arith.constant 0 : i32
    return %c0_i32, %arg0 : i32, i32
  }
  func.func @transform_1(%arg0: i32) -> (i32, i32) {
    %c0_i32 = arith.constant 0 : i32
    %c0_i32_0 = arith.constant 0 : i32
    %c0_i32_1 = arith.constant 0 : i32
    return %c0_i32, %c0_i32_0 : i32, i32
  }
  func.func @transform_2(%arg0: i32) -> (i32, i32) {
    %c0_i32 = arith.constant 0 : i32
    %c0_i32_0 = arith.constant 0 : i32
    %c0_i32_1 = arith.constant 0 : i32
    return %c0_i32, %c0_i32_0 : i32, i32
  }
  func.func @transform_3(%arg0: i32) -> (i32, i32, i32) {
    %c0_i32 = arith.constant 0 : i32
    %c0_i32_0 = arith.constant 0 : i32
    %c0_i32_1 = arith.constant 0 : i32
    %c0_i32_2 = arith.constant 0 : i32
    return %c0_i32, %c0_i32_0, %c0_i32_1 : i32, i32, i32
  }
  func.func @transform_4(%arg0: i32) -> (i32, i32) {
    %c0_i32 = arith.constant 0 : i32
    %c0_i32_0 = arith.constant 0 : i32
    %c0_i32_1 = arith.constant 0 : i32
    return %c0_i32, %c0_i32_0 : i32, i32
  }
  func.func @transform_5(%arg0: i32) -> (i32, i32) {
    %c0_i32 = arith.constant 0 : i32
    %c0_i32_0 = arith.constant 0 : i32
    %c0_i32_1 = arith.constant 0 : i32
    return %c0_i32, %c0_i32_0 : i32, i32
  }
  func.func @transform_6(%arg0: i32) -> (i32, i32) {
    %c0_i32 = arith.constant 0 : i32
    %c0_i32_0 = arith.constant 0 : i32
    return %c0_i32, %arg0 : i32, i32
  }
}

</mosaic_0001>

<bundles_post_ra>
// kernel: tpu_custom_call.1
= control target key start
LH: loop header
LB: loop body
LE: loop exit
PB: predicated region body
PF: predicated region fallthrough
CT: control target
= control target key end

     0   :  { %v2158_v1 = vmov 0   ;;  %s2507_s0 = inlined_call_operand.vmem [shape: f32[8,512], index: 0, kind: input, shape index: {}]   ;;  %s2508_s1 = inlined_call_operand.vmem [shape: f32[40,1], index: 1, kind: input, shape index: {}]   ;;  %s2509_s2 = inlined_call_operand.vmem [shape: f32[8,8], index: 2, kind: input, shape index: {}]   ;;  %s2510_s3 = inlined_call_operand.vmem [shape: f32[9,4,8], index: 3, kind: input, shape index: {}]   ;;  %s2511_s4 = inlined_call_operand.vmem [shape: f32[8,4], index: 4, kind: input, shape index: {}]   ;;  %s2512_s5 = inlined_call_operand.vmem [shape: f32[8,512], index: 5, kind: input, shape index: {}]   ;;  %s2513_s6 = inlined_call_operand.hbm [shape: f32[8,512], index: 6, kind: output, shape index: {}]  }
   0x1   :  { %v24_v0 = vld [vmem:[%s2508_s1] sm:$0xff]  ;;  %2134 = vset.pattern.permute.xlu0 %v2158_v1  ;;  %2135 = vset.pattern.permute.xlu1 %v2158_v1 }
   0x2   :  { %35 = vperm.xlu0 %2134, %v24_v0  }
   0x3   :  { %11 = vsyncpa [#allocation3], 0  ;;  %v25_v2 = vld [vmem:[%s2508_s1 + $0x8] sm:$0xff]  ;;  %v2159_v3 = vmov 0.0   ;;  %v26_v4 = vld [vmem:[%s2508_s1 + $0x10] sm:$0xff]  ;;  %vm61_vm0 = vcmask 64512   ;;  %v221_v39 = vlaneseq }
   0x4   :  { %129 = vmatprep.mubr.f32.mxu0 %v2159_v3  ;;  %200 = vmatprep.mubr.f32.mxu1 %v2159_v3  ;;  %v2218_v5 = vld [vmem:[%s2507_s0 + $0x8] sm:$0xff]  ;;  %v2223_v7 = vld [vmem:[%s2507_s0 + $0x18] sm:$0xff]  ;;  %v2228_v8 = vld [vmem:[%s2507_s0] sm:$0xff]  ;;  %s2161_s12 = smov 16   ;;  %s2162_s13 = smov 15   ;;  %vm1905_vm9 = vcmask 1043456  }
   0x5   :  { %58 = vperm.xlu1 %2135, %v26_v4   ;;  %v2233_v9 = vld [vmem:[%s2507_s0 + $0x10] sm:$0xff]  ;;  %v55_v23 = vld [vmem:[%s2509_s2] sm:$0xff]  ;;  %s2160_s2 = smov 17   ;;  %s2163_s14 = smov 1   ;;  %v27_v37 = vld [vmem:[%s2508_s1 + $0x18] sm:$0xf] }
   0x6   :  { %44 = vperm.xlu0 %2134, %v25_v2   ;;  %s2164_s15 = smov 127   ;;  %s2165_s16 = smov 113   ;;  %v28_v38 = vld [vmem:[%s2508_s1 + $0x20] sm:$0xff]  ;;  %v231_v40 = vshrl.u32 %v221_v39, 7  ;;  %v2292_v41 = vand.u32 127, %v221_v39  ;;  %vm1901_vm10 = vcmask 31744  }
   0x7   :  { %s2166_s17 = smov 112   ;;  %s2167_s18 = smov 111   ;;  %v228_v43 = vld [vmem:[%s2512_s5] ss:$8 sm:$0xf] }
   0x8   :  { %v2294_v42 = vsub.s32 1, %v231_v40  ;;  %vm223_vm1 = vcmp.lt.s32.totalorder %v2292_v41, 17  ;;  %v2301_v46 = vsub.s32 0, %v231_v40  ;;  %v2303_v47 = vsub.s32 3, %v231_v40  ;;  %v254_v2 = vld [vmem:[%s2510_s3] sm:$0xf] }
   0x9   :  { %v2305_v48 = vsub.s32 2, %v231_v40  ;;  %v2089_v56 = vld [vmem:[%s2512_s5 + $0x1] ss:$8 sm:$0xf]  ;;  %vm553_vm2 = vcmp.lt.s32.totalorder %v2292_v41, 16  ;;  %vm744_vm3 = vcmp.lt.s32.totalorder %v2292_v41, 15 }
   0xa   :  { %v237_v45 = vrot.slane %v228_v43, %v2294_v42  ;;  %v233_v53 = vrot.slane %v228_v43, %v2301_v46  ;;  %v245_v54 = vrot.slane %v228_v43, %v2303_v47  ;;  %v568_v0 = vrot.slane %v2089_v56, %v2294_v42 }
   0xb   :  { %v241_v55 = vrot.slane %v228_v43, %v2305_v48  ;;  %vm935_vm4 = vcmp.lt.s32.totalorder %v2292_v41, 1  ;;  %vm1126_vm5 = vcmp.lt.s32.totalorder %v2292_v41, 127  ;;  %vm1317_vm6 = vcmp.lt.s32.totalorder %v2292_v41, 113 }
   0xc   :  { %vm1508_vm7 = vcmp.lt.s32.totalorder %v2292_v41, 112  ;;  %vm1699_vm8 = vcmp.lt.s32.totalorder %v2292_v41, 111 }
  0x7d   :  { %v36_v6 = vpop.permute.xlu0 %35 }
  0x7e   :  { %v39_v10 = vmul.f32 %v36_v6, %v2218_v5  ;;  %v41_v11 = vmul.f32 %v36_v6, %v2223_v7  ;;  %v38_v12 = vmul.f32 %v36_v6, %v2228_v8  ;;  %v40_v13 = vmul.f32 %v36_v6, %v2233_v9 }
  0x80   :  { %v59_v24 = vpop.permute.xlu1 %58 }
  0x81   :  { %v45_v14 = vpop.permute.xlu0 %44 }
  0x82   :  { %v48_v15 = vadd.f32 %v45_v14, %v39_v10  ;;  %v50_v16 = vadd.f32 %v45_v14, %v41_v11  ;;  %v47_v17 = vadd.f32 %v45_v14, %v38_v12  ;;  %v49_v18 = vadd.f32 %v45_v14, %v40_v13 }
  0x83   :  { %v564_v12 = vrot.slane %v2089_v56, %v2301_v46  ;;  %v576_v13 = vrot.slane %v2089_v56, %v2303_v47  ;;  %v572_v14 = vrot.slane %v2089_v56, %v2305_v48 }
  0x84   :  { %v52_v19 = vmax.f32 %v48_v15, 0.0  ;;  %v54_v20 = vmax.f32 %v50_v16, 0.0  ;;  %v51_v21 = vmax.f32 %v47_v17, 0.0  ;;  %v53_v22 = vmax.f32 %v49_v18, 0.0  ;;  %v2084_v16 = vld [vmem:[%s2510_s3 + $0x10] sm:$0xf] }
  0x85   :  { %v2093_v15 = vld [vmem:[%s2512_s5 + $0x2] ss:$8 sm:$0xf] }
  0x86   :  { %95 = vmatprep.subr.mxu0 %v52_v19  ;;  %166 = vmatprep.subr.mxu1 %v54_v20 }
  0x87   :  { %96 = vmatpush1.msra.mxu0 %v51_v21  ;;  %167 = vmatpush1.msra.mxu1 %v53_v22 }
  0x88   :  { %2082 = vmatmul.mubr.msk.f32.vlgmr.msra.gmra.mxu0 %vm61_vm0, %v55_v23  ;;  %2083 = vmatmul.mubr.msk.f32.vlgmr.msra.gmra.mxu1 %vm61_vm0, %v55_v23 }
  0x89   :  { %322 = vmatprep.mubr.f32.mxu0 %v2159_v3  ;;  %393 = vmatprep.mubr.f32.mxu1 %v2159_v3 }
 0x148   :  { %v131_v25 = vpop.f32.mrf.mxu0  ;;  %v202_v26 = vpop.f32.mrf.mxu1 }
 0x149   :  { %v132_v27 = vadd.f32 %v131_v25, %v59_v24  ;;  %v203_v31 = vadd.f32 %v202_v26, %v59_v24  ;;  %v2090_v26 = vld [vmem:[%s2510_s3 + $0x4] sm:$0xf] }
 0x14a   :  { %v133_v28 = vpop.f32.mrf.mxu0  ;;  %v204_v29 = vpop.f32.mrf.mxu1 }
 0x14b   :  { %v2246_v30 = vmax.f32 %v132_v27, 0.0  ;;  %v134_v32 = vadd.f32 %v133_v28, %v59_v24  ;;  %v205_v34 = vadd.f32 %v204_v29, %v59_v24  ;;  %v2251_v35 = vmax.f32 %v203_v31, 0.0 }
 0x14c   :  { %v759_v24 = vrot.slane %v2093_v15, %v2294_v42  ;;  %v755_v31 = vrot.slane %v2093_v15, %v2301_v46 }
 0x14d   :  { %v2248_v33 = vmax.f32 %v134_v32, 0.0  ;;  %213 = vrot.lane.b32.xlu1 %v2246_v30, %s2160_s2  ;;  %v2254_v36 = vmax.f32 %v205_v34, 0.0  ;;  %v767_v32 = vrot.slane %v2093_v15, %v2303_v47  ;;  %v2097_v34 = vld [vmem:[%s2512_s5 + $0x3] ss:$8 sm:$0xf] }
 0x14e   :  { %v954_v56 = vrot.slane %v2097_v34, %v2305_v48 }
 0x14f   :  { %215 = vrot.lane.b32.xlu0 %v2248_v33, %s2160_s2 }
 0x151   :  { %217 = vrot.lane.b32.xlu1 %v2251_v35, %s2160_s2 }
 0x153   :  { %219 = vrot.lane.b32.xlu0 %v2254_v36, %s2160_s2 }
 0x155   :  { %545 = vrot.lane.b32.xlu1 %v2246_v30, %s2161_s12 }
 0x157   :  { %547 = vrot.lane.b32.xlu0 %v2248_v33, %s2161_s12 }
 0x159   :  { %549 = vrot.lane.b32.xlu1 %v2251_v35, %s2161_s12 }
 0x15b   :  { %551 = vrot.lane.b32.xlu0 %v2254_v36, %s2161_s12 }
 0x15d   :  { %736 = vrot.lane.b32.xlu1 %v2246_v30, %s2162_s13 }
 0x15f   :  { %738 = vrot.lane.b32.xlu0 %v2248_v33, %s2162_s13 }
 0x161   :  { %740 = vrot.lane.b32.xlu1 %v2251_v35, %s2162_s13 }
 0x163   :  { %742 = vrot.lane.b32.xlu0 %v2254_v36, %s2162_s13 }
 0x165   :  { %927 = vrot.lane.b32.xlu1 %v2246_v30, %s2163_s14 }
 0x167   :  { %929 = vrot.lane.b32.xlu0 %v2248_v33, %s2163_s14 }
 0x169   :  { %931 = vrot.lane.b32.xlu1 %v2251_v35, %s2163_s14 }
 0x16b   :  { %933 = vrot.lane.b32.xlu0 %v2254_v36, %s2163_s14 }
 0x16d   :  { %1118 = vrot.lane.b32.xlu1 %v2246_v30, %s2164_s15 }
 0x16f   :  { %1120 = vrot.lane.b32.xlu0 %v2248_v33, %s2164_s15 }
 0x171   :  { %1122 = vrot.lane.b32.xlu1 %v2251_v35, %s2164_s15 }
 0x173   :  { %1124 = vrot.lane.b32.xlu0 %v2254_v36, %s2164_s15 }
 0x175   :  { %1309 = vrot.lane.b32.xlu1 %v2246_v30, %s2165_s16 }
 0x177   :  { %1311 = vrot.lane.b32.xlu0 %v2248_v33, %s2165_s16 }
 0x179   :  { %1313 = vrot.lane.b32.xlu1 %v2251_v35, %s2165_s16 }
 0x17b   :  { %1315 = vrot.lane.b32.xlu0 %v2254_v36, %s2165_s16 }
 0x17d   :  { %1500 = vrot.lane.b32.xlu1 %v2246_v30, %s2166_s17 }
 0x17f   :  { %1502 = vrot.lane.b32.xlu0 %v2248_v33, %s2166_s17 }
 0x181   :  { %1504 = vrot.lane.b32.xlu1 %v2251_v35, %s2166_s17 }
 0x183   :  { %1506 = vrot.lane.b32.xlu0 %v2254_v36, %s2166_s17 }
 0x185   :  { %1691 = vrot.lane.b32.xlu1 %v2246_v30, %s2167_s18 }
 0x187   :  { %1693 = vrot.lane.b32.xlu0 %v2248_v33, %s2167_s18 }
 0x189   :  { %1695 = vrot.lane.b32.xlu1 %v2251_v35, %s2167_s18 }
 0x18b   :  { %1697 = vrot.lane.b32.xlu0 %v2254_v36, %s2167_s18 }
 0x18d   :  { %1884 = vperm.xlu1 %2135, %v27_v37  }
 0x18f   :  { %1898 = vperm.xlu0 %2134, %v28_v38  }
 0x1bf   :  { %v214_v44 = vpop.permute.xlu1 %213 }
 0x1c1   :  { %v216_v49 = vpop.permute.xlu0 %215 }
 0x1c2   :  { %v226_v50 = vsel %vm223_vm1, %v214_v44, %v216_v49 }
 0x1c3   :  { %v251_v51 = vmul.f32 %v237_v45, %v226_v50  ;;  %v218_v52 = vpop.permute.xlu1 %217  ;;  %v2094_v45 = vld [vmem:[%s2510_s3 + $0x8] sm:$0xf] }
 0x1c4   :  { %v225_v57 = vsel %vm223_vm1, %v216_v49, %v218_v52 }
 0x1c5   :  { %v220_v58 = vpop.permute.xlu0 %219  ;;  %288 = vmatprep.subr.mxu0 %v251_v51  ;;  %v252_v1 = vmul.f32 %v241_v55, %v225_v57  ;;  %v958_v55 = vrot.slane %v2097_v34, %v2303_v47 }
 0x1c6   :  { %v224_v59 = vsel %vm223_vm1, %v218_v52, %v220_v58  ;;  %v227_v60 = vsel %vm223_vm1, %v220_v58, %v214_v44  ;;  %v950_v44 = vrot.slane %v2097_v34, %v2294_v42 }
 0x1c7   :  { %v250_v61 = vmul.f32 %v233_v53, %v227_v60  ;;  %v253_v62 = vmul.f32 %v245_v54, %v224_v59  ;;  %v546_v63 = vpop.permute.xlu1 %545  ;;  %v946_v54 = vrot.slane %v2097_v34, %v2301_v46 }
 0x1c9   :  { %v548_v4 = vpop.permute.xlu0 %547  ;;  %289 = vmatpush1.msra.mxu0 %v250_v61  ;;  %359 = vmatprep.subr.mxu1 %v253_v62 }
 0x1ca   :  { %v556_v6 = vsel %vm553_vm2, %v546_v63, %v548_v4  ;;  %360 = vmatpush1.msra.mxu1 %v252_v1  ;;  %433 = vmatprep.subr.mxu0 %v2248_v33  ;;  %v763_v33 = vrot.slane %v2093_v15, %v2305_v48  ;;  %v2098_v1 = vld [vmem:[%s2510_s3 + $0xc] sm:$0xf] }
 0x1cb   :  { %v582_v10 = vmul.f32 %v568_v0, %v556_v6  ;;  %2085 = vmatmul.mubr.msk.f32.vlgmr.msra.gmra.mxu0 %vm61_vm0, %v254_v2  ;;  %504 = vmatprep.subr.mxu1 %v2254_v36  ;;  %v550_v11 = vpop.permute.xlu1 %549  ;;  %v2101_v0 = vld [vmem:[%s2512_s5 + $0x4] ss:$8 sm:$0xf] }
 0x1cc   :  { %434 = vmatpush1.msra.mxu0 %v2246_v30  ;;  %2086 = vmatmul.mubr.msk.f32.vlgmr.msra.gmra.mxu1 %vm61_vm0, %v254_v2  ;;  %v555_v17 = vsel %vm553_vm2, %v548_v4, %v550_v11  ;;  %v1141_v6 = vrot.slane %v2101_v0, %v2294_v42 }
 0x1cd   :  { %505 = vmatpush1.msra.mxu1 %v2251_v35  ;;  %v552_v18 = vpop.permute.xlu0 %551  ;;  %620 = vmatprep.subr.mxu0 %v582_v10  ;;  %v583_v25 = vmul.f32 %v572_v14, %v555_v17  ;;  %v1137_v10 = vrot.slane %v2101_v0, %v2301_v46  ;;  %v1149_v14 = vrot.slane %v2101_v0, %v2303_v47 }
 0x1ce   :  { %v554_v19 = vsel %vm553_vm2, %v550_v11, %v552_v18  ;;  %v557_v20 = vsel %vm553_vm2, %v552_v18, %v546_v63  ;;  %467 = vmatprep.mubr.f32.mxu0 %v2159_v3  ;;  %538 = vmatprep.mubr.f32.mxu1 %v2159_v3 }
 0x1cf   :  { %v581_v21 = vmul.f32 %v564_v12, %v557_v20  ;;  %v584_v22 = vmul.f32 %v576_v13, %v554_v19  ;;  %v737_v23 = vpop.permute.xlu1 %736  ;;  %2087 = vmatmul.mubr.msk.f32.vlgmr.msra.gmra.mxu0 %vm61_vm0, %v2084_v16  ;;  %v1145_v13 = vrot.slane %v2101_v0, %v2305_v48 }
 0x1d0   :  { %2088 = vmatmul.mubr.msk.f32.vlgmr.msra.gmra.mxu1 %vm61_vm0, %v2084_v16  ;;  %654 = vmatprep.mubr.f32.mxu0 %v2159_v3 }
 0x1d1   :  { %v739_v27 = vpop.permute.xlu0 %738  ;;  %621 = vmatpush1.msra.mxu0 %v581_v21  ;;  %691 = vmatprep.subr.mxu1 %v584_v22  ;;  %v2102_v21 = vld [vmem:[%s2510_s3 + $0x14] sm:$0xf] }
 0x1d2   :  { %v747_v28 = vsel %vm744_vm3, %v737_v23, %v739_v27  ;;  %692 = vmatpush1.msra.mxu1 %v583_v25  ;;  %725 = vmatprep.mubr.f32.mxu1 %v2159_v3  ;;  %v2105_v25 = vld [vmem:[%s2512_s5 + $0x5] ss:$8 sm:$0xf] }
 0x1d3   :  { %v773_v29 = vmul.f32 %v759_v24, %v747_v28  ;;  %v741_v30 = vpop.permute.xlu1 %740  ;;  %2091 = vmatmul.mubr.msk.f32.vlgmr.msra.gmra.mxu0 %vm61_vm0, %v2090_v26  ;;  %v1328_v28 = vrot.slane %v2105_v25, %v2301_v46 }
 0x1d4   :  { %2092 = vmatmul.mubr.msk.f32.vlgmr.msra.gmra.mxu1 %vm61_vm0, %v2090_v26  ;;  %845 = vmatprep.mubr.f32.mxu0 %v2159_v3  ;;  %v746_v35 = vsel %vm744_vm3, %v739_v27, %v741_v30  ;;  %v1332_v27 = vrot.slane %v2105_v25, %v2294_v42 }
 0x1d5   :  { %v743_v36 = vpop.permute.xlu0 %742  ;;  %811 = vmatprep.subr.mxu0 %v773_v29  ;;  %916 = vmatprep.mubr.f32.mxu1 %v2159_v3  ;;  %v774_v49 = vmul.f32 %v763_v33, %v746_v35 }
 0x1d6   :  { %v745_v37 = vsel %vm744_vm3, %v741_v30, %v743_v36  ;;  %v748_v38 = vsel %vm744_vm3, %v743_v36, %v737_v23 }
 0x1d7   :  { %v772_v39 = vmul.f32 %v755_v31, %v748_v38  ;;  %v775_v40 = vmul.f32 %v767_v32, %v745_v37  ;;  %v928_v43 = vpop.permute.xlu1 %927  ;;  %v1336_v31 = vrot.slane %v2105_v25, %v2305_v48  ;;  %v1340_v32 = vrot.slane %v2105_v25, %v2303_v47 }
 0x1d9   :  { %v930_v50 = vpop.permute.xlu0 %929  ;;  %812 = vmatpush1.msra.mxu0 %v772_v39  ;;  %882 = vmatprep.subr.mxu1 %v775_v40  ;;  %v2106_v39 = vld [vmem:[%s2510_s3 + $0x18] sm:$0xf] }
 0x1da   :  { %v938_v51 = vsel %vm935_vm4, %v928_v43, %v930_v50  ;;  %883 = vmatpush1.msra.mxu1 %v774_v49  ;;  %2095 = vmatmul.mubr.msk.f32.vlgmr.msra.gmra.mxu0 %vm61_vm0, %v2094_v45 }
 0x1db   :  { %v964_v52 = vmul.f32 %v950_v44, %v938_v51  ;;  %v932_v53 = vpop.permute.xlu1 %931  ;;  %2096 = vmatmul.mubr.msk.f32.vlgmr.msra.gmra.mxu1 %vm61_vm0, %v2094_v45  ;;  %1036 = vmatprep.mubr.f32.mxu0 %v2159_v3  ;;  %v2109_v45 = vld [vmem:[%s2512_s5 + $0x6] ss:$8 sm:$0xf] }
 0x1dc   :  { %1107 = vmatprep.mubr.f32.mxu1 %v2159_v3  ;;  %v937_v57 = vsel %vm935_vm4, %v930_v50, %v932_v53  ;;  %v1523_v50 = vrot.slane %v2109_v45, %v2294_v42  ;;  %v1519_v51 = vrot.slane %v2109_v45, %v2301_v46 }
 0x1dd   :  { %v934_v58 = vpop.permute.xlu0 %933  ;;  %1002 = vmatprep.subr.mxu0 %v964_v52  ;;  %v965_v2 = vmul.f32 %v954_v56, %v937_v57 }
 0x1de   :  { %v936_v59 = vsel %vm935_vm4, %v932_v53, %v934_v58  ;;  %v939_v60 = vsel %vm935_vm4, %v934_v58, %v928_v43 }
 0x1df   :  { %v963_v61 = vmul.f32 %v946_v54, %v939_v60  ;;  %v966_v62 = vmul.f32 %v958_v55, %v936_v59  ;;  %v1119_v63 = vpop.permute.xlu1 %1118  ;;  %v1527_v54 = vrot.slane %v2109_v45, %v2305_v48  ;;  %v1531_v55 = vrot.slane %v2109_v45, %v2303_v47 }
 0x1e1   :  { %v1121_v4 = vpop.permute.xlu0 %1120  ;;  %1003 = vmatpush1.msra.mxu0 %v963_v61  ;;  %1073 = vmatprep.subr.mxu1 %v966_v62  ;;  %v2110_v62 = vld [vmem:[%s2510_s3 + $0x1c] sm:$0xf] }
 0x1e2   :  { %1074 = vmatpush1.msra.mxu1 %v965_v2  ;;  %2099 = vmatmul.mubr.msk.f32.vlgmr.msra.gmra.mxu0 %vm61_vm0, %v2098_v1  ;;  %v1129_v11 = vsel %vm1126_vm5, %v1119_v63, %v1121_v4  ;;  %v2113_v2 = vld [vmem:[%s2512_s5 + $0x7] ss:$8 sm:$0xf] }
 0x1e3   :  { %v1123_v12 = vpop.permute.xlu1 %1122  ;;  %2100 = vmatmul.mubr.msk.f32.vlgmr.msra.gmra.mxu1 %vm61_vm0, %v2098_v1  ;;  %1227 = vmatprep.mubr.f32.mxu0 %v2159_v3  ;;  %v1154_v18 = vmul.f32 %v1137_v10, %v1129_v11  ;;  %v1710_v10 = vrot.slane %v2113_v2, %v2301_v46 }
 0x1e4   :  { %v1128_v15 = vsel %vm1126_vm5, %v1121_v4, %v1123_v12  ;;  %1298 = vmatprep.mubr.f32.mxu1 %v2159_v3 }
 0x1e5   :  { %v1155_v16 = vmul.f32 %v1141_v6, %v1128_v15  ;;  %v1125_v17 = vpop.permute.xlu0 %1124  ;;  %v1714_v6 = vrot.slane %v2113_v2, %v2294_v42 }
 0x1e6   :  { %v1127_v19 = vsel %vm1126_vm5, %v1123_v12, %v1125_v17  ;;  %v1130_v20 = vsel %vm1126_vm5, %v1125_v17, %v1119_v63 }
 0x1e7   :  { %v1156_v22 = vmul.f32 %v1145_v13, %v1127_v19  ;;  %v1157_v23 = vmul.f32 %v1149_v14, %v1130_v20  ;;  %1193 = vmatprep.subr.mxu0 %v1155_v16  ;;  %v1310_v24 = vpop.permute.xlu1 %1309  ;;  %v1718_v13 = vrot.slane %v2113_v2, %v2305_v48  ;;  %v1722_v14 = vrot.slane %v2113_v2, %v2303_v47  ;;  %v2114_v48 = vld [vmem:[%s2510_s3 + $0x20] sm:$0xf] }
 0x1e8   :  { %1194 = vmatpush1.msra.mxu0 %v1154_v18 }
 0x1e9   :  { %v1312_v26 = vpop.permute.xlu0 %1311  ;;  %2103 = vmatmul.mubr.msk.f32.vlgmr.msra.gmra.mxu0 %vm61_vm0, %v2102_v21  ;;  %1264 = vmatprep.subr.mxu1 %v1157_v23 }
 0x1ea   :  { %1265 = vmatpush1.msra.mxu1 %v1156_v22  ;;  %1418 = vmatprep.mubr.f32.mxu0 %v2159_v3  ;;  %v1320_v29 = vsel %vm1317_vm6, %v1310_v24, %v1312_v26 }
 0x1eb   :  { %2104 = vmatmul.mubr.msk.f32.vlgmr.msra.gmra.mxu1 %vm61_vm0, %v2102_v21  ;;  %v1314_v30 = vpop.permute.xlu1 %1313  ;;  %v1345_v36 = vmul.f32 %v1328_v28, %v1320_v29 }
 0x1ec   :  { %v1319_v33 = vsel %vm1317_vm6, %v1312_v26, %v1314_v30  ;;  %1489 = vmatprep.mubr.f32.mxu1 %v2159_v3 }
 0x1ed   :  { %v1346_v34 = vmul.f32 %v1332_v27, %v1319_v33  ;;  %v1316_v35 = vpop.permute.xlu0 %1315 }
 0x1ee   :  { %v1318_v37 = vsel %vm1317_vm6, %v1314_v30, %v1316_v35  ;;  %v1321_v38 = vsel %vm1317_vm6, %v1316_v35, %v1310_v24 }
 0x1ef   :  { %v1347_v40 = vmul.f32 %v1336_v31, %v1318_v37  ;;  %v1348_v43 = vmul.f32 %v1340_v32, %v1321_v38  ;;  %1384 = vmatprep.subr.mxu0 %v1346_v34  ;;  %v1501_v44 = vpop.permute.xlu1 %1500 }
 0x1f0   :  { %1385 = vmatpush1.msra.mxu0 %v1345_v36 }
 0x1f1   :  { %v1503_v49 = vpop.permute.xlu0 %1502  ;;  %2107 = vmatmul.mubr.msk.f32.vlgmr.msra.gmra.mxu0 %vm61_vm0, %v2106_v39  ;;  %1455 = vmatprep.subr.mxu1 %v1348_v43 }
 0x1f2   :  { %1456 = vmatpush1.msra.mxu1 %v1347_v40  ;;  %1609 = vmatprep.mubr.f32.mxu0 %v2159_v3  ;;  %v1511_v52 = vsel %vm1508_vm7, %v1501_v44, %v1503_v49 }
 0x1f3   :  { %2108 = vmatmul.mubr.msk.f32.vlgmr.msra.gmra.mxu1 %vm61_vm0, %v2106_v39  ;;  %v1505_v53 = vpop.permute.xlu1 %1504  ;;  %v1536_v59 = vmul.f32 %v1519_v51, %v1511_v52 }
 0x1f4   :  { %v1510_v56 = vsel %vm1508_vm7, %v1503_v49, %v1505_v53  ;;  %1680 = vmatprep.mubr.f32.mxu1 %v2159_v3 }
 0x1f5   :  { %v1537_v57 = vmul.f32 %v1523_v50, %v1510_v56  ;;  %v1507_v58 = vpop.permute.xlu0 %1506 }
 0x1f6   :  { %v1509_v60 = vsel %vm1508_vm7, %v1505_v53, %v1507_v58  ;;  %v1512_v61 = vsel %vm1508_vm7, %v1507_v58, %v1501_v44 }
 0x1f7   :  { %v1538_v63 = vmul.f32 %v1527_v54, %v1509_v60  ;;  %v1539_v0 = vmul.f32 %v1531_v55, %v1512_v61  ;;  %1575 = vmatprep.subr.mxu0 %v1537_v57  ;;  %v1692_v1 = vpop.permute.xlu1 %1691 }
 0x1f8   :  { %1576 = vmatpush1.msra.mxu0 %v1536_v59 }
 0x1f9   :  { %v1694_v4 = vpop.permute.xlu0 %1693  ;;  %2111 = vmatmul.mubr.msk.f32.vlgmr.msra.gmra.mxu0 %vm61_vm0, %v2110_v62  ;;  %1646 = vmatprep.subr.mxu1 %v1539_v0 }
 0x1fa   :  { %1647 = vmatpush1.msra.mxu1 %v1538_v63  ;;  %1800 = vmatprep.mubr.f32.mxu0 %v2159_v3  ;;  %v1702_v11 = vsel %vm1699_vm8, %v1692_v1, %v1694_v4 }
 0x1fb   :  { %2112 = vmatmul.mubr.msk.f32.vlgmr.msra.gmra.mxu1 %vm61_vm0, %v2110_v62  ;;  %v1696_v12 = vpop.permute.xlu1 %1695  ;;  %v1727_v16 = vmul.f32 %v1710_v10, %v1702_v11 }
 0x1fc   :  { %v1701_v15 = vsel %vm1699_vm8, %v1694_v4, %v1696_v12  ;;  %1871 = vmatprep.mubr.f32.mxu1 %v2159_v3 }
 0x1fd   :  { %v1728_v42 = vmul.f32 %v1714_v6, %v1701_v15  ;;  %v1698_v46 = vpop.permute.xlu0 %1697 }
 0x1fe   :  { %v1700_v17 = vsel %vm1699_vm8, %v1696_v12, %v1698_v46  ;;  %v1703_v18 = vsel %vm1699_vm8, %v1698_v46, %v1692_v1 }
 0x1ff   :  { %v1729_v19 = vmul.f32 %v1718_v13, %v1700_v17  ;;  %v1730_v47 = vmul.f32 %v1722_v14, %v1703_v18  ;;  %1766 = vmatprep.subr.mxu0 %v1728_v42 }
 0x200   :  { %1767 = vmatpush1.msra.mxu0 %v1727_v16 }
 0x201   :  { %2115 = vmatmul.mubr.msk.f32.vlgmr.msra.gmra.mxu0 %vm61_vm0, %v2114_v48  ;;  %1837 = vmatprep.subr.mxu1 %v1730_v47 }
 0x202   :  { %1838 = vmatpush1.msra.mxu1 %v1729_v19  ;;  %1982 = vmatprep.mubr.f32.mxu0 %v2159_v3 }
 0x203   :  { %2116 = vmatmul.mubr.msk.f32.vlgmr.msra.gmra.mxu1 %vm61_vm0, %v2114_v48 }
 0x204   :  { %2053 = vmatprep.mubr.f32.mxu1 %v2159_v3 }
 0x28b   :  { %v324_v41 = vpop.f32.mrf.mxu0 }
 0x28c   :  { %v395_v20 = vpop.f32.mrf.mxu1 }
 0x28d   :  { %v326_v21 = vpop.f32.mrf.mxu0 }
 0x28e   :  { %v397_v22 = vpop.f32.mrf.mxu1 }
 0x28f   :  { %v469_v23 = vpop.f32.mrf.mxu0 }
 0x290   :  { %v540_v24 = vpop.f32.mrf.mxu1  ;;  %v470_v3 = vadd.f32 %v469_v23, %v324_v41 }
 0x291   :  { %v471_v25 = vpop.f32.mrf.mxu0  ;;  %v541_v40 = vadd.f32 %v540_v24, %v395_v20 }
 0x292   :  { %v542_v26 = vpop.f32.mrf.mxu1  ;;  %v472_v39 = vadd.f32 %v471_v25, %v326_v21 }
 0x293   :  { %v656_v27 = vpop.f32.mrf.mxu0  ;;  %v543_v49 = vadd.f32 %v542_v26, %v397_v22  ;;  %v1885_v22 = vpop.permute.xlu1 %1884 }
 0x294   :  { %v727_v28 = vpop.f32.mrf.mxu1  ;;  %v732_v44 = vadd.f32 %v656_v27, %v470_v3 }
 0x295   :  { %v658_v29 = vpop.f32.mrf.mxu0  ;;  %v734_v51 = vadd.f32 %v727_v28, %v541_v40 }
 0x296   :  { %v729_v30 = vpop.f32.mrf.mxu1  ;;  %v733_v50 = vadd.f32 %v658_v29, %v472_v39 }
 0x297   :  { %v735_v56 = vadd.f32 %v729_v30, %v543_v49 }
 0x29a   :  { %v847_v31 = vpop.f32.mrf.mxu0 }
 0x29b   :  { %v918_v32 = vpop.f32.mrf.mxu1  ;;  %v923_v53 = vadd.f32 %v847_v31, %v732_v44 }
 0x29c   :  { %v849_v33 = vpop.f32.mrf.mxu0  ;;  %v925_v58 = vadd.f32 %v918_v32, %v734_v51 }
 0x29d   :  { %v920_v34 = vpop.f32.mrf.mxu1  ;;  %v924_v57 = vadd.f32 %v849_v33, %v733_v50 }
 0x29e   :  { %v926_v62 = vadd.f32 %v920_v34, %v735_v56  ;;  %v1895_v34 = vld [vmem:[%s2511_s4] sm:$0xff]  ;;  %s2168_s4 = smov [#allocation2]  }
 0x29f   :  { %s2074_s29 = sshll.u32 %s2168_s4, 4  ;;  %s2075_s29 = int_to_ptr.vmem [resolvable:$true] %s2074_s29 }
 0x2a0   :  { %s2136_s30 = scalar_lea.vmem %s2075_s29, 512  ;;  %p2141_p1 = scmp.lt.s32.totalorder %s2075_s29, %s2075_s29 }
 0x2a1   :  { %p2137_p0 = scmp.ne.s32.totalorder %s2075_s29, %s2136_s30  ;;  %p2142_p2 = scmp.lt.s32.totalorder %s2136_s30, %s2136_s30 }
 0x2a2   :  { %v1038_v35 = vpop.f32.mrf.mxu0 }
 0x2a3   :  { %v1109_v36 = vpop.f32.mrf.mxu1  ;;  %v1114_v60 = vadd.f32 %v1038_v35, %v923_v53  ;;  %p2143_p3 = por %p2142_p2, %p2141_p1 }
 0x2a4   :  { %v1040_v37 = vpop.f32.mrf.mxu0  ;;  %v1116_v0 = vadd.f32 %v1109_v36, %v925_v58 }
 0x2a5   :  { %v1111_v38 = vpop.f32.mrf.mxu1  ;;  %v1115_v63 = vadd.f32 %v1040_v37, %v924_v57  ;;  %v1899_v37 = vpop.permute.xlu0 %1898  ;;  %p2144_p4 = pnand %p2143_p3, %p2137_p0 }
 0x2a6   :  { %v1117_v10 = vadd.f32 %v1111_v38, %v926_v62 }
 0x2a9   :  { %v1229_v43 = vpop.f32.mrf.mxu0 }
 0x2aa   :  { %v1305_v4 = vadd.f32 %v1229_v43, %v1114_v60 }
 0x2ab   :  { %v1300_v45 = vpop.f32.mrf.mxu1  ;;  %v1231_v52 = vpop.f32.mrf.mxu0 }
 0x2ac   :  { %v1306_v11 = vadd.f32 %v1231_v52, %v1115_v63  ;;  %v1307_v12 = vadd.f32 %v1300_v45, %v1116_v0 }
 0x2ad   :  { %v1302_v54 = vpop.f32.mrf.mxu1 }
 0x2ae   :  { %v1308_v15 = vadd.f32 %v1302_v54, %v1117_v10 }
 0x2b1   :  { %v1420_v55 = vpop.f32.mrf.mxu0 }
 0x2b2   :  { %v1496_v13 = vadd.f32 %v1420_v55, %v1305_v4 }
 0x2b3   :  { %v1491_v59 = vpop.f32.mrf.mxu1  ;;  %v1422_v61 = vpop.f32.mrf.mxu0 }
 0x2b4   :  { %v1497_v42 = vadd.f32 %v1422_v61, %v1306_v11  ;;  %v1498_v46 = vadd.f32 %v1491_v59, %v1307_v12 }
 0x2b5   :  { %v1493_v1 = vpop.f32.mrf.mxu1 }
 0x2b6   :  { %v1499_v48 = vadd.f32 %v1493_v1, %v1308_v15 }
 0x2b9   :  { %v1611_v2 = vpop.f32.mrf.mxu0 }
 0x2ba   :  { %v1687_v16 = vadd.f32 %v1611_v2, %v1496_v13 }
 0x2bb   :  { %v1682_v6 = vpop.f32.mrf.mxu1  ;;  %v1613_v14 = vpop.f32.mrf.mxu0 }
 0x2bc   :  { %v1688_v19 = vadd.f32 %v1613_v14, %v1497_v42  ;;  %v1689_v47 = vadd.f32 %v1682_v6, %v1498_v46 }
 0x2bd   :  { %v1684_v17 = vpop.f32.mrf.mxu1 }
 0x2be   :  { %v1690_v23 = vadd.f32 %v1684_v17, %v1499_v48 }
 0x2c1   :  { %v1802_v18 = vpop.f32.mrf.mxu0 }
 0x2c2   :  { %v1878_v41 = vadd.f32 %v1802_v18, %v1687_v16 }
 0x2c3   :  { %v1804_v20 = vpop.f32.mrf.mxu0  ;;  %v1873_v21 = vpop.f32.mrf.mxu1 }
 0x2c4   :  { %v1879_v24 = vadd.f32 %v1804_v20, %v1688_v19  ;;  %v1880_v25 = vadd.f32 %v1873_v21, %v1689_v47  ;;  %v1887_v26 = vadd.f32 %v1885_v22, %v1878_v41 }
 0x2c5   :  { %v1875_v27 = vpop.f32.mrf.mxu1 }
 0x2c6   :  { %v1888_v28 = vadd.f32 %v1885_v22, %v1879_v24  ;;  %v1881_v29 = vadd.f32 %v1875_v27, %v1690_v23  ;;  %v1889_v30 = vadd.f32 %v1885_v22, %v1880_v25  ;;  %v1891_v33 = vmax.f32 %v1887_v26, 0.0 }
 0x2c8   :  { %v1892_v31 = vmax.f32 %v1888_v28, 0.0  ;;  %v1890_v32 = vadd.f32 %v1885_v22, %v1881_v29  ;;  %v1893_v36 = vmax.f32 %v1889_v30, 0.0 }
 0x2ca   :  { %v1894_v35 = vmax.f32 %v1890_v32, 0.0  ;;  %2117 = vmatprep.subr.msk.mxu0 %vm1905_vm9, %v1892_v31 }
 0x2cb   :  { %2118 = vmatpush1.msk.msra.mxu0 %vm1905_vm9, %v1891_v33 }
 0x2cc   :  { %2119 = vmatmul.mubr.msk.f32.vlgmr.msra.gmra.mxu0 %vm1901_vm10, %v1895_v34  ;;  %2120 = vmatprep.subr.msk.mxu1 %vm1905_vm9, %v1894_v35 }
 0x2cd   :  { %2121 = vmatpush1.msk.msra.mxu1 %vm1905_vm9, %v1893_v36 }
 0x2ce   :  { %2122 = vmatmul.mubr.msk.f32.vlgmr.msra.gmra.mxu1 %vm1901_vm10, %v1895_v34 }
 0x38c   :  { %v1984_v3 = vpop.f32.mrf.mxu0 }
 0x38d   :  { %v1985_v38 = vadd.f32 %v1984_v3, %v1899_v37 }
 0x38e   :  { %v1986_v39 = vpop.f32.mrf.mxu0  ;;  %v2055_v40 = vpop.f32.mrf.mxu1 }
 0x38f   :  { %v2060_v43 = vadd.f32 %v1985_v38, %v2228_v8  ;;  %v1987_v44 = vadd.f32 %v1986_v39, %v1899_v37  ;;  %v2056_v45 = vadd.f32 %v2055_v40, %v1899_v37 }
 0x390   :  { %v2057_v49 = vpop.f32.mrf.mxu1 }
 0x391   :  { %2064 = vst [vmem:[#allocation2] sm:$0xff] %v2060_v43  ;;  %v2061_v50 = vadd.f32 %v1987_v44, %v2218_v5  ;;  %v2062_v51 = vadd.f32 %v2056_v45, %v2233_v9  ;;  %v2058_v52 = vadd.f32 %v2057_v49, %v1899_v37 }
 0x393   :  { %2065 = vst [vmem:[#allocation2 + $0x8] sm:$0xff] %v2061_v50  ;;  %2066 = vst [vmem:[#allocation2 + $0x10] sm:$0xff] %v2062_v51  ;;  %v2063_v53 = vadd.f32 %v2058_v52, %v2223_v7 }
 0x395   :  { %2067 = vst [vmem:[#allocation2 + $0x18] sm:$0xff] %v2063_v53 }
 0x396   :  { %2147 = shalt.err (!%p2144_p4)
}
 0x397   :  { %2077 = dma.vmem_to_hbm [thread:$0]  %s2075_s29, 512, %s2513_s6, [#allocation3]  }
 0x398   :  { %2156 = dma.done.wait [#allocation3], 512  }
 0x399   :  { %2157 = vsyncadd [#allocation3], 4294966784 }
 0x39a   :  { %2081 = vsyncpa [#allocation3], 1 }

</bundles_post_ra>
